<compile_context>
chip_gen: v7x
topology: tpu7x:2x2x1
jax: 0.10.0
libtpu: 0.0.40
codegen_flags: <defaults>
</compile_context>

<pallas_src>
import functools
import math

import jax
import jax.numpy as jnp
from jax.experimental import pallas as pl
from jax.experimental.pallas import tpu as pltpu

LN_EPS = 1e-12  # HuggingFace BertLayerNorm default epsilon
VMEM_LIMIT = 64 * 1024 * 1024  # explicit scoped-VMEM ceiling (fits v7x's 64 MiB)


def _gelu(x):
    # TODO(synk): HF BERT default is exact erf-GELU; tanh approximation used here
    # (numerically very close, lowers cleanly to the TPU EUP).
    c = math.sqrt(2.0 / math.pi)
    return 0.5 * x * (1.0 + jnp.tanh(c * (x + 0.044715 * x * x * x)))


# ------------------------------ tiling helpers ------------------------------

def _row_tile(m, pref=256):
    """Row (sublane) tile: multiple of 8 dividing m, capped at pref, else m."""
    if m >= pref and m % pref == 0:
        return pref
    for t in (512, 256, 128, 64, 32, 16, 8):
        if t <= pref and m % t == 0:
            return t
    return m


def _lane_tile(n, pref=512):
    """Lane tile: multiple of 128 dividing n, else the full dim."""
    for t in (pref, 384, 256, 128):
        if n >= t and n % t == 0:
            return t
    return n


def _heads_per_block(nh, dh):
    """Group heads so the attention block width is a multiple of 128 (or = H)."""
    if dh % 128 == 0:
        return 1
    if 128 % dh == 0 and nh % (128 // dh) == 0:
        return 128 // dh
    return nh  # block width == H == full last dim


# ----------------------------- generic tiled dense ---------------------------

def dense_kernel(x_ref, w_ref, b_ref, o_ref, acc_ref, *, activation):
    @pl.when(pl.program_id(2) == 0)
    def _():
        acc_ref[...] = jnp.zeros_like(acc_ref)

    acc_ref[...] += jnp.dot(x_ref[...], w_ref[...],
                            preferred_element_type=jnp.float32)

    @pl.when(pl.program_id(2) == pl.num_programs(2) - 1)
    def _():
        y = acc_ref[...] + b_ref[...].astype(jnp.float32)
        if activation == "gelu":
            y = _gelu(y)
        elif activation == "tanh":
            y = jnp.tanh(y)
        o_ref[...] = y.astype(o_ref.dtype)


def pallas_dense(x, w, b, activation="none", out_dtype=jnp.float32):
    M, K = x.shape
    N = w.shape[1]
    tm, tk, tn = _row_tile(M), _lane_tile(K), _lane_tile(N)
    flops = 2 * M * K * N
    bytes_acc = int((M * K + K * N) * x.dtype.itemsize
                    + M * N * jnp.dtype(out_dtype).itemsize)
    return pl.pallas_call(
        functools.partial(dense_kernel, activation=activation),
        out_shape=jax.ShapeDtypeStruct((M, N), out_dtype),
        grid=(M // tm, N // tn, K // tk),
        in_specs=[pl.BlockSpec((tm, tk), lambda i, j, k: (i, k)),
                  pl.BlockSpec((tk, tn), lambda i, j, k: (k, j)),
                  pl.BlockSpec((1, tn), lambda i, j, k: (0, j))],
        out_specs=pl.BlockSpec((tm, tn), lambda i, j, k: (i, j)),
        scratch_shapes=[pltpu.VMEM((tm, tn), jnp.float32)],
        compiler_params=pltpu.CompilerParams(
            dimension_semantics=("parallel", "parallel", "arbitrary"),
            vmem_limit_bytes=VMEM_LIMIT),
        cost_estimate=pl.CostEstimate(flops=flops, transcendentals=0,
                                      bytes_accessed=bytes_acc),
    )(x, w, b.reshape(1, N).astype(jnp.float32))


# --------------------------------- LayerNorm ---------------------------------

def ln_kernel(x_ref, g_ref, b_ref, o_ref):
    x = x_ref[...].astype(jnp.float32)
    mu = jnp.mean(x, axis=-1, keepdims=True)
    xc = x - mu
    var = jnp.mean(xc * xc, axis=-1, keepdims=True)
    o_ref[...] = (xc * jax.lax.rsqrt(var + LN_EPS) * g_ref[...]
                  + b_ref[...]).astype(o_ref.dtype)


def pallas_layernorm(x, gamma, beta, out_dtype=jnp.bfloat16):
    M, H = x.shape
    tm = _row_tile(M)
    return pl.pallas_call(
        ln_kernel,
        out_shape=jax.ShapeDtypeStruct((M, H), out_dtype),
        grid=(M // tm,),
        in_specs=[pl.BlockSpec((tm, H), lambda i: (i, 0)),
                  pl.BlockSpec((1, H), lambda i: (0, 0)),
                  pl.BlockSpec((1, H), lambda i: (0, 0))],
        out_specs=pl.BlockSpec((tm, H), lambda i: (i, 0)),
        compiler_params=pltpu.CompilerParams(
            dimension_semantics=("parallel",)),
    )(x, gamma.reshape(1, H), beta.reshape(1, H))


# ----------------------- fused QKV projection (1 launch) ---------------------

def qkv_kernel(x_ref, wq_ref, wk_ref, wv_ref, b_ref, q_ref, k_ref, v_ref, *, scale):
    x = x_ref[...]
    b = b_ref[...].astype(jnp.float32)          # (3, H)
    q = jnp.dot(x, wq_ref[...], preferred_element_type=jnp.float32) + b[0]
    k = jnp.dot(x, wk_ref[...], preferred_element_type=jnp.float32) + b[1]
    v = jnp.dot(x, wv_ref[...], preferred_element_type=jnp.float32) + b[2]
    q_ref[...] = (q * scale).astype(q_ref.dtype)   # fold 1/sqrt(dh) into q
    k_ref[...] = k.astype(k_ref.dtype)
    v_ref[...] = v.astype(v_ref.dtype)


def pallas_qkv(x, wq, wk, wv, bqkv, scale):
    M, H = x.shape
    tm = _row_tile(M)
    out = jax.ShapeDtypeStruct((M, H), jnp.bfloat16)
    flops = 3 * 2 * M * H * H
    bytes_acc = int(M * H * 2 + 3 * H * H * 2 + 3 * M * H * 2)
    return pl.pallas_call(
        functools.partial(qkv_kernel, scale=scale),
        out_shape=(out, out, out),
        grid=(M // tm,),
        in_specs=[pl.BlockSpec((tm, H), lambda i: (i, 0)),
                  pl.BlockSpec((H, H), lambda i: (0, 0)),
                  pl.BlockSpec((H, H), lambda i: (0, 0)),
                  pl.BlockSpec((H, H), lambda i: (0, 0)),
                  pl.BlockSpec((3, H), lambda i: (0, 0))],
        out_specs=(pl.BlockSpec((tm, H), lambda i: (i, 0)),
                   pl.BlockSpec((tm, H), lambda i: (i, 0)),
                   pl.BlockSpec((tm, H), lambda i: (i, 0))),
        compiler_params=pltpu.CompilerParams(
            dimension_semantics=("parallel",), vmem_limit_bytes=VMEM_LIMIT),
        cost_estimate=pl.CostEstimate(flops=flops, transcendentals=0,
                                      bytes_accessed=bytes_acc),
    )(x, wq, wk, wv, bqkv)


# ------------------------------ attention kernel -----------------------------

def attn_kernel(q_ref, k_ref, v_ref, m_ref, o_ref, *, hpb, dh):
    m = m_ref[0].astype(jnp.float32)            # (1, S) additive mask
    outs = []
    for h in range(hpb):                        # small static unroll over heads
        sl = slice(h * dh, (h + 1) * dh)
        q = q_ref[:, sl]                        # (S, dh) bf16, already scaled
        k = k_ref[:, sl]
        v = v_ref[:, sl]
        s = jax.lax.dot_general(q, k, (((1,), (1,)), ((), ())),
                                preferred_element_type=jnp.float32) + m
        s = s - jnp.max(s, axis=-1, keepdims=True)
        p = jnp.exp(s)
        p = p * pl.reciprocal(jnp.sum(p, axis=-1, keepdims=True), approx=True)
        outs.append(jnp.dot(p.astype(v.dtype), v,
                            preferred_element_type=jnp.float32))
    o = outs[0] if hpb == 1 else jnp.concatenate(outs, axis=-1)
    o_ref[...] = o.astype(o_ref.dtype)


def pallas_attention(q, k, v, addmask, *, B, S, nh, dh, hpb):
    H = nh * dh
    ng = nh // hpb
    bw = hpb * dh
    flops = 2 * 2 * B * nh * S * S * dh
    return pl.pallas_call(
        functools.partial(attn_kernel, hpb=hpb, dh=dh),
        out_shape=jax.ShapeDtypeStruct((B * S, H), jnp.bfloat16),
        grid=(B, ng),
        in_specs=[pl.BlockSpec((S, bw), lambda b, g: (b, g)),
                  pl.BlockSpec((S, bw), lambda b, g: (b, g)),
                  pl.BlockSpec((S, bw), lambda b, g: (b, g)),
                  pl.BlockSpec((1, 1, S), lambda b, g: (b, 0, 0))],
        out_specs=pl.BlockSpec((S, bw), lambda b, g: (b, g)),
        compiler_params=pltpu.CompilerParams(
            dimension_semantics=("parallel", "parallel"),
            vmem_limit_bytes=VMEM_LIMIT),
        cost_estimate=pl.CostEstimate(flops=flops,
                                      transcendentals=B * nh * S * S,
                                      bytes_accessed=int(4 * B * S * H * 2)),
    )(q, k, v, addmask)


# ------------------ dense + residual + LayerNorm (fused epilogue) ------------

def dense_res_ln_kernel(x_ref, w_ref, b_ref, r_ref, g_ref, beta_ref, o_ref):
    y = jnp.dot(x_ref[...], w_ref[...], preferred_element_type=jnp.float32)
    y = y + b_ref[...].astype(jnp.float32) + r_ref[...].astype(jnp.float32)
    mu = jnp.mean(y, axis=-1, keepdims=True)
    yc = y - mu
    var = jnp.mean(yc * yc, axis=-1, keepdims=True)
    o_ref[...] = (yc * jax.lax.rsqrt(var + LN_EPS) * g_ref[...]
                  + beta_ref[...]).astype(o_ref.dtype)


def pallas_dense_res_ln(x, w, b, residual, gamma, beta, out_dtype=jnp.bfloat16):
    M, K = x.shape
    N = w.shape[1]
    tm = _row_tile(M)
    return pl.pallas_call(
        dense_res_ln_kernel,
        out_shape=jax.ShapeDtypeStruct((M, N), out_dtype),
        grid=(M // tm,),
        in_specs=[pl.BlockSpec((tm, K), lambda i: (i, 0)),
                  pl.BlockSpec((K, N), lambda i: (0, 0)),
                  pl.BlockSpec((1, N), lambda i: (0, 0)),
                  pl.BlockSpec((tm, N), lambda i: (i, 0)),
                  pl.BlockSpec((1, N), lambda i: (0, 0)),
                  pl.BlockSpec((1, N), lambda i: (0, 0))],
        out_specs=pl.BlockSpec((tm, N), lambda i: (i, 0)),
        compiler_params=pltpu.CompilerParams(
            dimension_semantics=("parallel",), vmem_limit_bytes=VMEM_LIMIT),
        cost_estimate=pl.CostEstimate(flops=2 * M * K * N, transcendentals=0,
                                      bytes_accessed=int(3 * M * N * 2 + K * N * 2)),
    )(x, w, b.reshape(1, N).astype(jnp.float32), residual,
      gamma.reshape(1, N), beta.reshape(1, N))


# ----------------- fused FFN: Wi + GELU + Wo2 + residual + LN -----------------

def ffn_kernel(x_ref, wi_ref, bi_ref, wo2_ref, bo2_ref, g_ref, beta_ref, o_ref):
    x = x_ref[...]                                         # (tm, H) bf16
    inter = jnp.dot(x, wi_ref[...], preferred_element_type=jnp.float32)
    inter = _gelu(inter + bi_ref[...].astype(jnp.float32))  # (tm, I) stays in VMEM
    y = jnp.dot(inter.astype(wo2_ref.dtype), wo2_ref[...],
                preferred_element_type=jnp.float32)
    y = y + bo2_ref[...].astype(jnp.float32) + x.astype(jnp.float32)  # residual
    mu = jnp.mean(y, axis=-1, keepdims=True)
    yc = y - mu
    var = jnp.mean(yc * yc, axis=-1, keepdims=True)
    o_ref[...] = (yc * jax.lax.rsqrt(var + LN_EPS) * g_ref[...]
                  + beta_ref[...]).astype(o_ref.dtype)


def pallas_ffn(x, wi, bi, wo2, bo2, gamma, beta, out_dtype=jnp.bfloat16):
    M, H = x.shape
    I = wi.shape[1]
    tm = _row_tile(M)
    flops = 2 * M * H * I * 2
    bytes_acc = int(2 * M * H * 2 + (H * I + I * H) * 2)
    return pl.pallas_call(
        ffn_kernel,
        out_shape=jax.ShapeDtypeStruct((M, H), out_dtype),
        grid=(M // tm,),
        in_specs=[pl.BlockSpec((tm, H), lambda i: (i, 0)),
                  pl.BlockSpec((H, I), lambda i: (0, 0)),
                  pl.BlockSpec((1, I), lambda i: (0, 0)),
                  pl.BlockSpec((I, H), lambda i: (0, 0)),
                  pl.BlockSpec((1, H), lambda i: (0, 0)),
                  pl.BlockSpec((1, H), lambda i: (0, 0)),
                  pl.BlockSpec((1, H), lambda i: (0, 0))],
        out_specs=pl.BlockSpec((tm, H), lambda i: (i, 0)),
        compiler_params=pltpu.CompilerParams(
            dimension_semantics=("parallel",), vmem_limit_bytes=VMEM_LIMIT),
        cost_estimate=pl.CostEstimate(flops=flops, transcendentals=M * I,
                                      bytes_accessed=bytes_acc),
    )(x, wi, bi.reshape(1, I).astype(jnp.float32), wo2,
      bo2.reshape(1, H).astype(jnp.float32),
      gamma.reshape(1, H), beta.reshape(1, H))


# ---------------------------- sequence pooling --------------------------------

def seq_pool_kernel(h_ref, o_ref, *, mode):
    h = h_ref[...].astype(jnp.float32)          # (bt, S, H)
    if mode == "mean":
        o_ref[...] = jnp.mean(h, axis=1)
    else:
        o_ref[...] = jnp.max(h, axis=1)


def pallas_seq_pool(h, mode):
    # TODO(synk): matches the reference sequencial_pool (no attention-mask
    # weighting of padding tokens).
    B, S, H = h.shape
    bt = _row_tile(B, pref=8)
    return pl.pallas_call(
        functools.partial(seq_pool_kernel, mode=mode),
        out_shape=jax.ShapeDtypeStruct((B, H), jnp.float32),
        grid=(B // bt,),
        in_specs=[pl.BlockSpec((bt, S, H), lambda i: (i, 0, 0))],
        out_specs=pl.BlockSpec((bt, H), lambda i: (i, 0)),
        compiler_params=pltpu.CompilerParams(
            dimension_semantics=("parallel",)),
    )(h)


# ------------------------------ BERT forward -------------------------------

def init_bert_params(key, cfg):
    V, H, I, L = cfg["vocab"], cfg["hidden"], cfg["intermediate"], cfg["layers"]
    P, T = cfg["max_pos"], cfg["type_vocab"]
    std = 0.02

    def nrm(k, shape):
        return (std * jax.random.normal(k, shape)).astype(jnp.float32)

    keys = iter(jax.random.split(key, 8 + L * 8))
    params = {
        "word_emb": nrm(next(keys), (V, H)),
        "pos_emb": nrm(next(keys), (P, H)),
        "type_emb": nrm(next(keys), (T, H)),
        "emb_ln_g": jnp.ones((H,), jnp.float32),
        "emb_ln_b": jnp.zeros((H,), jnp.float32),
        "wp": nrm(next(keys), (H, H)),
        "bp": jnp.zeros((H,), jnp.float32),
        "layers": [],
    }
    for _ in range(L):
        lp = {
            "wq": nrm(next(keys), (H, H)), "bq": jnp.zeros((H,), jnp.float32),
            "wk": nrm(next(keys), (H, H)), "bk": jnp.zeros((H,), jnp.float32),
            "wv": nrm(next(keys), (H, H)), "bv": jnp.zeros((H,), jnp.float32),
            "wo": nrm(next(keys), (H, H)), "bo": jnp.zeros((H,), jnp.float32),
            "ln1_g": jnp.ones((H,), jnp.float32), "ln1_b": jnp.zeros((H,), jnp.float32),
            "wi": nrm(next(keys), (H, I)), "bi": jnp.zeros((I,), jnp.float32),
            "wo2": nrm(next(keys), (I, H)), "bo2": jnp.zeros((H,), jnp.float32),
            "ln2_g": jnp.ones((H,), jnp.float32), "ln2_b": jnp.zeros((H,), jnp.float32),
        }
        params["layers"].append(lp)
    return params


def sent_encoder_bert_forward(params, input_ids, attention_mask=None,
                              token_type_ids=None, *, cfg, pool_type="first_token"):
    B, S = input_ids.shape
    H, nh = cfg["hidden"], cfg["heads"]
    dh = H // nh
    M = B * S
    bf16 = jnp.bfloat16

    if attention_mask is None:
        attention_mask = jnp.ones((B, S), jnp.float32)
    if token_type_ids is None:
        token_type_ids = jnp.zeros((B, S), jnp.int32)

    # Embeddings (gathers are plain-JAX glue), then LayerNorm in Pallas -> bf16.
    we = params["word_emb"][input_ids]                 # (B, S, H)
    pe = params["pos_emb"][:S][None, :, :]             # (1, S, H)
    te = params["type_emb"][token_type_ids]            # (B, S, H)
    emb = (we + pe + te).reshape(M, H)
    h = pallas_layernorm(emb, params["emb_ln_g"], params["emb_ln_b"],
                         out_dtype=bf16)

    # Extended additive attention mask, one copy per batch (no per-head replication).
    addmask = ((1.0 - attention_mask.astype(jnp.float32)) * -10000.0)[:, None, :]

    scale = 1.0 / math.sqrt(dh)
    hpb = _heads_per_block(nh, dh)

    for lp in params["layers"]:
        x = h                                           # residual (B*S, H) bf16
        bqkv = jnp.stack([lp["bq"], lp["bk"], lp["bv"]]).astype(jnp.float32)
        q, k, v = pallas_qkv(x, lp["wq"].astype(bf16), lp["wk"].astype(bf16),
                             lp["wv"].astype(bf16), bqkv, scale)
        ctx = pallas_attention(q, k, v, addmask, B=B, S=S, nh=nh, dh=dh, hpb=hpb)
        h = pallas_dense_res_ln(ctx, lp["wo"].astype(bf16), lp["bo"], x,
                                lp["ln1_g"], lp["ln1_b"], out_dtype=bf16)
        h = pallas_ffn(h, lp["wi"].astype(bf16), lp["bi"],
                       lp["wo2"].astype(bf16), lp["bo2"],
                       lp["ln2_g"], lp["ln2_b"], out_dtype=bf16)

    hidden = h.reshape(B, S, H)
    if pool_type == "first_token":
        # BertPooler: dense + tanh on the [CLS] (first) token.
        first = hidden[:, 0, :]                         # (B, H)
        pooled = pallas_dense(first, params["wp"].astype(bf16), params["bp"],
                              activation="tanh", out_dtype=jnp.float32)
    else:
        # sequencial_pool over the last_hidden_state (mean / max).
        pooled = pallas_seq_pool(hidden, pool_type)
    return pooled


# ---------------------------------- main ------------------------------------

if __name__ == "__main__":
    cfg = dict(vocab=50, hidden=32, intermediate=64, layers=2,
               heads=2, max_pos=16, type_vocab=2)
    B, S = 2, 8

    key = jax.random.PRNGKey(0)
    kp, kx = jax.random.split(key)
    params = init_bert_params(kp, cfg)

    input_ids = jax.random.randint(kx, (B, S), 0, cfg["vocab"], dtype=jnp.int32)
    attention_mask = jnp.ones((B, S), jnp.float32)
    token_type_ids = jnp.zeros((B, S), jnp.int32)

    out_first = sent_encoder_bert_forward(params, input_ids, attention_mask,
                                          token_type_ids, cfg=cfg,
                                          pool_type="first_token")
    out_mean = sent_encoder_bert_forward(params, input_ids, attention_mask,
                                         token_type_ids, cfg=cfg,
                                         pool_type="mean")
    out_max = sent_encoder_bert_forward(params, input_ids, attention_mask,
                                        token_type_ids, cfg=cfg,
                                        pool_type="max")
    jax.block_until_ready(out_first)
    jax.block_until_ready(out_mean)
    jax.block_until_ready(out_max)
    assert out_first.shape == (B, cfg["hidden"])
    assert out_mean.shape == (B, cfg["hidden"])
    assert out_max.shape == (B, cfg["hidden"])
    print("KERNEL_OK")
</pallas_src>

<mosaic_0001>
module attributes {stable_mosaic.version = 11 : i64} {
  func.func @ln_kernel(%arg0: i32, %arg1: memref<16x32xf32, #tpu.memory_space<vmem>>, %arg2: memref<1x32xf32, #tpu.memory_space<vmem>>, %arg3: memref<1x32xf32, #tpu.memory_space<vmem>>, %arg4: memref<16x32xbf16, #tpu.memory_space<vmem>>) attributes {dimension_semantics = [#tpu.dimension_semantics<parallel>], iteration_bounds = array<i64: 1>, scalar_prefetch = 0 : i64, scratch_operands = 0 : i64, tpu.core_type = #tpu.core_type<tc>, window_params = [{transform_indices = @transform_0, window_bounds = array<i64: 16, 32>}, {pipeline_mode = #tpu.pipeline_mode<synchronous>, transform_indices = @transform_1, window_bounds = array<i64: 1, 32>}, {pipeline_mode = #tpu.pipeline_mode<synchronous>, transform_indices = @transform_2, window_bounds = array<i64: 1, 32>}, {transform_indices = @transform_3, window_bounds = array<i64: 16, 32>}]} {
    %c0 = arith.constant 0 : index
    %c0_0 = arith.constant 0 : index
    %0 = vector.load %arg1[%c0, %c0_0] : memref<16x32xf32, #tpu.memory_space<vmem>>, vector<16x32xf32>
    %cst = arith.constant dense<0.000000e+00> : vector<16xf32>
    %1 = vector.multi_reduction <add>, %0, %cst [1] : vector<16x32xf32> to vector<16xf32>
    %2 = vector.shape_cast %1 : vector<16xf32> to vector<16x1xf32>
    %cst_1 = arith.constant 3.200000e+01 : f32
    %3 = vector.broadcast %cst_1 : f32 to vector<16x1xf32>
    %4 = arith.divf %2, %3 : vector<16x1xf32>
    %5 = vector.broadcast %4 : vector<16x1xf32> to vector<16x32xf32>
    %6 = arith.subf %0, %5 : vector<16x32xf32>
    %7 = arith.mulf %6, %6 : vector<16x32xf32>
    %cst_2 = arith.constant dense<0.000000e+00> : vector<16xf32>
    %8 = vector.multi_reduction <add>, %7, %cst_2 [1] : vector<16x32xf32> to vector<16xf32>
    %9 = vector.shape_cast %8 : vector<16xf32> to vector<16x1xf32>
    %cst_3 = arith.constant 3.200000e+01 : f32
    %10 = vector.broadcast %cst_3 : f32 to vector<16x1xf32>
    %11 = arith.divf %9, %10 : vector<16x1xf32>
    %cst_4 = arith.constant 9.99999996E-13 : f32
    %12 = vector.broadcast %cst_4 : f32 to vector<16x1xf32>
    %13 = arith.addf %11, %12 : vector<16x1xf32>
    %14 = math.rsqrt %13 : vector<16x1xf32>
    %15 = vector.broadcast %14 : vector<16x1xf32> to vector<16x32xf32>
    %16 = arith.mulf %6, %15 : vector<16x32xf32>
    %c0_5 = arith.constant 0 : index
    %c0_6 = arith.constant 0 : index
    %17 = vector.load %arg2[%c0_5, %c0_6] : memref<1x32xf32, #tpu.memory_space<vmem>>, vector<1x32xf32>
    %18 = vector.broadcast %17 : vector<1x32xf32> to vector<16x32xf32>
    %19 = arith.mulf %16, %18 : vector<16x32xf32>
    %c0_7 = arith.constant 0 : index
    %c0_8 = arith.constant 0 : index
    %20 = vector.load %arg3[%c0_7, %c0_8] : memref<1x32xf32, #tpu.memory_space<vmem>>, vector<1x32xf32>
    %21 = vector.broadcast %20 : vector<1x32xf32> to vector<16x32xf32>
    %22 = arith.addf %19, %21 : vector<16x32xf32>
    %23 = arith.truncf %22 : vector<16x32xf32> to vector<16x32xbf16>
    %c0_9 = arith.constant 0 : index
    %c0_10 = arith.constant 0 : index
    %24 = vector.load %arg4[%c0_9, %c0_10] : memref<16x32xbf16, #tpu.memory_space<vmem>>, vector<16x32xbf16>
    tpu.vector_store %arg4[%c0_9, %c0_10], %23 {strides = array<i32>} : memref<16x32xbf16, #tpu.memory_space<vmem>>, vector<16x32xbf16>,
    return
  }
  func.func @transform_0(%arg0: i32) -> (i32, i32) {
    %c0_i32 = arith.constant 0 : i32
    %c0_i32_0 = arith.constant 0 : i32
    return %arg0, %c0_i32 : i32, i32
  }
  func.func @transform_1(%arg0: i32) -> (i32, i32) {
    %c0_i32 = arith.constant 0 : i32
    %c0_i32_0 = arith.constant 0 : i32
    %c0_i32_1 = arith.constant 0 : i32
    return %c0_i32, %c0_i32_0 : i32, i32
  }
  func.func @transform_2(%arg0: i32) -> (i32, i32) {
    %c0_i32 = arith.constant 0 : i32
    %c0_i32_0 = arith.constant 0 : i32
    %c0_i32_1 = arith.constant 0 : i32
    return %c0_i32, %c0_i32_0 : i32, i32
  }
  func.func @transform_3(%arg0: i32) -> (i32, i32) {
    %c0_i32 = arith.constant 0 : i32
    %c0_i32_0 = arith.constant 0 : i32
    return %arg0, %c0_i32 : i32, i32
  }
}

</mosaic_0001>

<bundles_post_ra>
// kernel: tpu_custom_call.1
= control target key start
LH: loop header
LB: loop body
LE: loop exit
PB: predicated region body
PF: predicated region fallthrough
CT: control target
= control target key end

     0   :  { %8 = vsyncpa [#allocation3], 0  ;;  %s229_s0 = inlined_call_operand.hbm [shape: f32[16,32], index: 0, kind: input, shape index: {}]   ;;  %s230_s1 = inlined_call_operand.vmem [shape: f32[1,32], index: 1, kind: input, shape index: {}]   ;;  %s231_s2 = inlined_call_operand.vmem [shape: f32[1,32], index: 2, kind: input, shape index: {}]   ;;  %s232_s3 = inlined_call_operand.hbm [shape: bf16[16,32], index: 3, kind: output, shape index: {}]  }
   0x1   :  { %9 = vsyncpa [#allocation4], 0  ;;  %s169_s12 = smov [#allocation2]   ;;  %s121_s16 = scalar_lea.hbm %s229_s0, 256 }
   0x2   :  { %s15_s13 = sshll.u32 %s169_s12, 4  ;;  %p122_p0 = scmp.ne.s32.totalorder %s229_s0, %s121_s16  ;;  %s16_s13 = int_to_ptr.vmem [resolvable:$true] %s15_s13 }
   0x3   :  { %p125_p1 = scmp.lt.u32.totalorder %s121_s16, %s229_s0 }
   0x5   :  { %p127_p2 = pnand %p125_p1, %p122_p0 }
   0x7   :  { %130 = shalt.err (!%p127_p2)
}
   0x8   :  { %s131_s21 = scalar_lea.vmem %s16_s13, 256  ;;  %p136_p4 = scmp.lt.s32.totalorder %s16_s13, %s16_s13 }
   0x9   :  { %p132_p3 = scmp.ne.s32.totalorder %s16_s13, %s131_s21  ;;  %p137_p5 = scmp.lt.s32.totalorder %s131_s21, %s131_s21 }
   0xb   :  { %p138_p6 = por %p137_p5, %p136_p4 }
   0xd   :  { %p139_p7 = pnand %p138_p6, %p132_p3 }
   0xf   :  { %142 = shalt.err (!%p139_p7)
}
  0x10   :  { %s170_s22 = smov 128   ;;  %s171_s23 = smov 8  }
  0x11   :  { %21 = dma.hbm_to_vmem [thread:$0]  %s229_s0, 256, %s16_s13, [#allocation3], %s170_s22, %s170_s22, %s171_s23  }
  0x12   :  { %165 = dma.done.wait [#allocation3], 256  }
  0x13   :  { %166 = vsyncadd [#allocation3], 4294967040  ;;  %vm31_vm0 = vcmask 261120   ;;  %v29_v0 = vld [vmem:[#allocation2] sm:$0xff]  ;;  %v30_v1 = vld [vmem:[#allocation2 + $0x8] sm:$0xff]  ;;  %vm85_vm1 = vcmask 257024  }
  0x14   :  { %v32_v2 = vsel %vm31_vm0, %v29_v0, 0.0  ;;  %v35_v3 = vsel %vm31_vm0, %v30_v1, 0.0  ;;  %v105_v21 = vld [vmem:[%s230_s1] ss:$0 sm:$0xff]  ;;  %s172_s29 = smov [#allocation5]  }
  0x15   :  { %33 = vadd.xlane.f32.xlu0 %v32_v2  ;;  %v106_v23 = vld [vmem:[%s231_s2] ss:$0 sm:$0xff]  ;;  %s93_s30 = sshll.u32 %s172_s29, 4  ;;  %s94_s30 = int_to_ptr.vmem [resolvable:$true] %s93_s30 }
  0x16   :  { %s143_s1 = scalar_lea.vmem %s94_s30, 128  ;;  %p148_p9 = scmp.lt.s32.totalorder %s94_s30, %s94_s30 }
  0x17   :  { %p144_p8 = scmp.ne.s32.totalorder %s94_s30, %s143_s1  ;;  %p149_p10 = scmp.lt.s32.totalorder %s143_s1, %s143_s1 }
  0x19   :  { %36 = vadd.xlane.f32.xlu0 %v35_v3  ;;  %p150_p11 = por %p149_p10, %p148_p9 }
  0x1b   :  { %p151_p12 = pnand %p150_p11, %p144_p8 }
  0xa2   :  { %v34_v4 = vpop.xlane.xlu0 %33 }
  0xa3   :  { %v39_v5 = vmul.f32 0.03125, %v34_v4 }
  0xa5   :  { %v41_v6 = vsub.f32 %v29_v0, %v39_v5 }
  0xa6   :  { %v37_v7 = vpop.xlane.xlu0 %36 }
  0xa7   :  { %v40_v8 = vmul.f32 0.03125, %v37_v7  ;;  %v43_v9 = vmul.f32 %v41_v6, %v41_v6 }
  0xa9   :  { %v42_v10 = vsub.f32 %v30_v1, %v40_v8  ;;  %v45_v11 = vsel %vm31_vm0, %v43_v9, 0.0 }
  0xaa   :  { %46 = vadd.xlane.f32.xlu1 %v45_v11 }
  0xab   :  { %v44_v12 = vmul.f32 %v42_v10, %v42_v10 }
  0xad   :  { %v48_v13 = vsel %vm31_vm0, %v44_v12, 0.0 }
  0xae   :  { %49 = vadd.xlane.f32.xlu1 %v48_v13 }
 0x137   :  { %v47_v14 = vpop.xlane.xlu1 %46 }
 0x138   :  { %v51_v15 = vmul.f32 0.03125, %v47_v14 }
 0x13a   :  { %v53_v16 = vadd.f32 1e-12, %v51_v15 }
 0x13b   :  { %v50_v17 = vpop.xlane.xlu1 %49 }
 0x13c   :  { %117 = vrsqrt.f32 %v53_v16  ;;  %v52_v18 = vmul.f32 0.03125, %v50_v17 }
 0x13e   :  { %v54_v19 = vadd.f32 1e-12, %v52_v18 }
 0x140   :  { %119 = vrsqrt.f32 %v54_v19 }
 0x146   :  { %v118_v20 = vpop.eup %117 }
 0x147   :  { %v57_v22 = vmul.f32 %v118_v20, %v41_v6 }
 0x149   :  { %v66_v24 = vmul.f32 %v105_v21, %v57_v22 }
 0x14a   :  { %v120_v25 = vpop.eup %119 }
 0x14b   :  { %v58_v26 = vmul.f32 %v120_v25, %v42_v10  ;;  %v75_v27 = vadd.f32 %v106_v23, %v66_v24 }
 0x14d   :  { %v67_v28 = vmul.f32 %v105_v21, %v58_v26  ;;  %v109_v29 = vpack.c.bf16 %v75_v27, %v75_v27 }
 0x14f   :  { %v76_v30 = vadd.f32 %v106_v23, %v67_v28  ;;  %86 = vst.msk [vmem:[#allocation5] sm:$0xf] %vm85_vm1, %v109_v29 }
 0x151   :  { %v110_v31 = vpack.c.bf16 %v76_v30, %v76_v30 }
 0x153   :  { %87 = vst.msk [vmem:[#allocation5 + $0x4] sm:$0xf] %vm85_vm1, %v110_v31 }
 0x154   :  { %154 = shalt.err (!%p151_p12)
}
 0x155   :  { %s155_s5 = scalar_lea.hbm %s232_s3, 128 }
 0x156   :  { %p156_p13 = scmp.ne.s32.totalorder %s232_s3, %s155_s5  ;;  %p159_p0 = scmp.lt.u32.totalorder %s155_s5, %s232_s3 }
 0x158   :  { %p161_p1 = pnand %p159_p0, %p156_p13 }
 0x15a   :  { %164 = shalt.err (!%p161_p1)
}
 0x15b   :  { %s173_s10 = smov 64   ;;  %s174_s11 = smov 4  }
 0x15c   :  { %99 = dma.vmem_to_hbm [thread:$0]  %s94_s30, 128, %s232_s3, [#allocation4], %s173_s10, %s173_s10, %s174_s11  }
 0x15d   :  { %167 = dma.done.wait [#allocation4], 128  }
 0x15e   :  { %168 = vsyncadd [#allocation4], 4294967168 }
 0x15f   :  { %103 = vsyncpa [#allocation3], 1 }
 0x160   :  { %104 = vsyncpa [#allocation4], 1 }

</bundles_post_ra>
